<compile_context>
chip_gen: v6e
topology: v6e:2x2x1
jax: 0.10.0
libtpu: 0.0.40
codegen_flags: <defaults>
</compile_context>

<pallas_src>
import functools

import jax
import jax.numpy as jnp
from jax import lax
from jax.experimental import pallas as pl
from jax.experimental.pallas import tpu as pltpu


def _self_attn_kernel(x_ref, wqkv_ref, bqkv_ref, gamma_ref, o_ref,
                      q_scr, k_scr, v_scr, *, ck, n_real, tile_n, mxu_dtype):
    """Grid = (batch, column_tile). Writes one (C, tile_n) output slab."""
    j = pl.program_id(1)
    n_pad = x_ref.shape[-1]

    # Fused Q/K/V projection, computed once per batch (j == 0) and cached in
    # VMEM scratch. The column-tile axis is 'arbitrary' so the cache persists.
    @pl.when(j == 0)
    def _():
        x = x_ref[...]                                           # (C, N_pad) f32
        qkv = jnp.dot(wqkv_ref[...].astype(mxu_dtype),
                      x.astype(mxu_dtype),
                      preferred_element_type=jnp.float32) + bqkv_ref[...]
        q_scr[...] = qkv[:ck].astype(mxu_dtype)                  # (Ck, N_pad)
        k_scr[...] = qkv[ck:2 * ck].astype(mxu_dtype)            # (Ck, N_pad)
        v_scr[...] = qkv[2 * ck:].astype(mxu_dtype)              # (C,  N_pad)

    col = pl.multiple_of(j * tile_n, tile_n)

    # scores[i, jt] = sum_c q[c, i] * k[c, col + jt]
    # Contract the leading (channel) dim on both sides -> MXU transposed-LHS
    # path, no explicit q.T.
    k_t = k_scr[:, pl.ds(col, tile_n)]                           # (Ck, tile_n)
    s = lax.dot_general(q_scr[...], k_t,
                        dimension_numbers=(((0,), (0,)), ((), ())),
                        preferred_element_type=jnp.float32)      # (N_pad, tile_n)

    # Mask out padded spatial rows so they do not enter the softmax.
    if n_pad > n_real:
        rows = lax.broadcasted_iota(jnp.int32, (n_pad, tile_n), 0)
        s = jnp.where(rows < n_real, s, -1e30)

    # torch: F.softmax(query_key, dim=1) on (B, N, N) => normalize over rows.
    # Softmax math kept in f32 (VPU/EUP); only MXU operands are cast.
    m = jnp.max(s, axis=0, keepdims=True)
    e = jnp.exp(s - m)
    attn = e * pl.reciprocal(jnp.sum(e, axis=0, keepdims=True), approx=True)

    # out[c, jt] = sum_i v[c, i] * attn[i, jt]; padded rows of attn are 0.
    out = jnp.dot(v_scr[...], attn.astype(mxu_dtype),
                  preferred_element_type=jnp.float32)            # (C, tile_n)

    x_res = x_ref[:, pl.ds(col, tile_n)]                         # (C, tile_n) f32
    o_ref[...] = (gamma_ref[0] * out + x_res).astype(o_ref.dtype)


def self_attention_pallas(x, wq, bq, wk, bk, wv, bv, gamma, *,
                          mxu_dtype=jnp.bfloat16, tile_n=None):
    """x: (B, C, H, W) float32. Weights already spectrally normalized.

    mxu_dtype: dtype of MXU matmul operands (accumulation is always f32);
               softmax and the residual path stay f32.
    """
    B, C, H, W = x.shape
    N = H * W
    Ck = wq.shape[0]
    QKV = 2 * Ck + C

    # Pad the flattened spatial dim to a lane-dense multiple of 128.
    N_pad = ((N + 127) // 128) * 128
    if tile_n is None:
        tile_n = next(t for t in (512, 256, 128) if N_pad % t == 0)
    assert N_pad % tile_n == 0
    ncol = N_pad // tile_n

    xf = x.reshape(B, C, N)
    if N_pad != N:
        xf = jnp.pad(xf, ((0, 0), (0, 0), (0, N_pad - N)))

    # Fuse the three 1x1-conv projections into one weight / one bias.
    wqkv = jnp.concatenate([wq, wk, wv], axis=0)                         # (QKV, C)
    bqkv = jnp.concatenate([bq.reshape(-1), bk.reshape(-1),
                            bv.reshape(-1)]).reshape(QKV, 1)             # (QKV, 1)
    gamma_s = jnp.reshape(gamma, (1,)).astype(jnp.float32)               # SMEM scalar

    kernel = functools.partial(_self_attn_kernel, ck=Ck, n_real=N,
                               tile_n=tile_n, mxu_dtype=mxu_dtype)

    cost = pl.CostEstimate(
        flops=int(2 * B * (QKV * C * N_pad
                           + Ck * N_pad * N_pad
                           + C * N_pad * N_pad)),
        transcendentals=int(B * N_pad * N_pad),
        bytes_accessed=int(4 * (2 * B * C * N_pad + QKV * C + QKV + 1)),
    )

    out = pl.pallas_call(
        kernel,
        out_shape=jax.ShapeDtypeStruct((B, C, N_pad), x.dtype),
        grid_spec=pltpu.PrefetchScalarGridSpec(
            num_scalar_prefetch=0,
            grid=(B, ncol),
            in_specs=[
                pl.BlockSpec((None, C, N_pad), lambda b, j: (b, 0, 0)),   # x slab
                pl.BlockSpec((QKV, C), lambda b, j: (0, 0)),              # fused W
                pl.BlockSpec((QKV, 1), lambda b, j: (0, 0)),              # fused b
                pl.BlockSpec(memory_space=pltpu.MemorySpace.SMEM),        # gamma
            ],
            out_specs=pl.BlockSpec((None, C, tile_n), lambda b, j: (b, 0, j)),
            scratch_shapes=[
                pltpu.VMEM((Ck, N_pad), mxu_dtype),   # cached q
                pltpu.VMEM((Ck, N_pad), mxu_dtype),   # cached k
                pltpu.VMEM((C, N_pad), mxu_dtype),    # cached v
            ],
        ),
        compiler_params=pltpu.CompilerParams(
            dimension_semantics=("parallel", "arbitrary"),
            vmem_limit_bytes=48 * 1024 * 1024,
        ),
        cost_estimate=cost,
    )(xf, wqkv, bqkv, gamma_s)

    return out[:, :, :N].reshape(B, C, H, W)


def _spectral_norm(w):
    # Exact spectral normalization: divide by the largest singular value of the
    # (out_ch, in_ch) weight matrix (deterministic equivalent of PyTorch's
    # power iteration).
    sigma = jnp.linalg.svd(w, compute_uv=False)[0]
    return w / sigma


def _init_params(key, C):
    Ck = C // 8
    ks = jax.random.split(key, 6)
    bound = 1.0 / jnp.sqrt(C)     # Conv1d default init bound, fan_in = C * 1
    wq = jax.random.uniform(ks[0], (Ck, C), jnp.float32, -bound, bound)
    bq = jax.random.uniform(ks[1], (Ck, 1), jnp.float32, -bound, bound)
    wk = jax.random.uniform(ks[2], (Ck, C), jnp.float32, -bound, bound)
    bk = jax.random.uniform(ks[3], (Ck, 1), jnp.float32, -bound, bound)
    wv = jax.random.uniform(ks[4], (C, C), jnp.float32, -bound, bound)
    bv = jax.random.uniform(ks[5], (C, 1), jnp.float32, -bound, bound)
    wq, wk, wv = _spectral_norm(wq), _spectral_norm(wk), _spectral_norm(wv)
    gamma = jnp.zeros((1, 1), jnp.float32)   # nn.Parameter(torch.tensor(0.0))
    return wq, bq, wk, bk, wv, bv, gamma


def _reference(x, wq, bq, wk, bk, wv, bv, gamma):
    # Pure-JAX reference mirroring the PyTorch forward.
    B, C, H, W = x.shape
    N = H * W
    xf = x.reshape(B, C, N)
    q = jnp.einsum('oc,bcn->bon', wq, xf) + bq[None]           # (B, Ck, N)
    k = jnp.einsum('oc,bcn->bon', wk, xf) + bk[None]
    v = jnp.einsum('oc,bcn->bon', wv, xf) + bv[None]
    qk = jnp.einsum('bci,bcj->bij', q, k)                      # (B, N, N)
    attn = jax.nn.softmax(qk, axis=1)                          # torch dim=1
    out = jnp.einsum('bci,bij->bcj', v, attn)                  # (B, C, N)
    return (gamma[0, 0] * out + xf).reshape(B, C, H, W)


if __name__ == "__main__":
    B, C, H, W = 2, 32, 8, 8        # in_channel=32 -> query/key channels = 4
    key = jax.random.PRNGKey(0)
    kx, kp = jax.random.split(key)
    x = jax.random.normal(kx, (B, C, H, W), jnp.float32)
    wq, bq, wk, bk, wv, bv, gamma = _init_params(kp, C)

    # Module default: gamma = 0.0  =>  output == input exactly (f32 residual).
    y = self_attention_pallas(x, wq, bq, wk, bk, wv, bv, gamma)
    jax.block_until_ready(y)
    assert jnp.allclose(y, x, atol=1e-6)

    # Validate the attention path with a nonzero gamma.
    gamma_chk = jnp.full((1, 1), 0.5, jnp.float32)
    y_ref = _reference(x, wq, bq, wk, bk, wv, bv, gamma_chk)

    # f32 MXU operands: tight structural / numerics check.
    y_f32 = self_attention_pallas(x, wq, bq, wk, bk, wv, bv, gamma_chk,
                                  mxu_dtype=jnp.float32)
    assert jnp.allclose(y_f32, y_ref, atol=1e-2, rtol=1e-2)

    # bf16 MXU operands (fast default): looser tolerance for bf16 rounding.
    y_bf16 = self_attention_pallas(x, wq, bq, wk, bk, wv, bv, gamma_chk)
    assert jnp.allclose(y_bf16, y_ref, atol=5e-2, rtol=5e-2)

    print("KERNEL_OK")
</pallas_src>

<mosaic_0001>
module attributes {stable_mosaic.version = 11 : i64} {
  func.func @_self_attn_kernel(%arg0: i32, %arg1: i32, %arg2: memref<1x32x128xf32, #tpu.memory_space<vmem>>, %arg3: memref<40x32xf32, #tpu.memory_space<vmem>>, %arg4: memref<40x1xf32, #tpu.memory_space<vmem>>, %arg5: memref<1xf32, #tpu.memory_space<smem>>, %arg6: memref<1x32x128xf32, #tpu.memory_space<vmem>>, %arg7: memref<4x128xbf16, #tpu.memory_space<vmem>>, %arg8: memref<4x128xbf16, #tpu.memory_space<vmem>>, %arg9: memref<32x128xbf16, #tpu.memory_space<vmem>>) attributes {dimension_semantics = [#tpu.dimension_semantics<parallel>, #tpu.dimension_semantics<arbitrary>], iteration_bounds = array<i64: 2, 1>, scalar_prefetch = 0 : i64, scratch_operands = 3 : i64, tpu.core_type = #tpu.core_type<tc>, window_params = [{transform_indices = @transform_0, window_bounds = array<i64: 1, 32, 128>}, {pipeline_mode = #tpu.pipeline_mode<synchronous>, transform_indices = @transform_1, window_bounds = array<i64: 40, 32>}, {pipeline_mode = #tpu.pipeline_mode<synchronous>, transform_indices = @transform_2, window_bounds = array<i64: 40, 1>}, {transform_indices = @transform_3, window_bounds = array<i64: 1>}, {transform_indices = @transform_4, window_bounds = array<i64: 1, 32, 128>}]} {
    %c0_i32 = arith.constant 0 : i32
    %0 = arith.cmpi eq, %arg1, %c0_i32 : i32
    %1 = arith.extui %0 : i1 to i32
    %c0_i32_0 = arith.constant 0 : i32
    %2 = arith.cmpi ne, %1, %c0_i32_0 : i32
    scf.if %2 {
      %c0_15 = arith.constant 0 : index
      %c0_16 = arith.constant 0 : index
      %c0_17 = arith.constant 0 : index
      %37 = vector.load %arg2[%c0_15, %c0_16, %c0_17] : memref<1x32x128xf32, #tpu.memory_space<vmem>>, vector<1x32x128xf32>
      %38 = vector.shape_cast %37 : vector<1x32x128xf32> to vector<32x128xf32>
      %c0_18 = arith.constant 0 : index
      %c0_19 = arith.constant 0 : index
      %39 = vector.load %arg3[%c0_18, %c0_19] : memref<40x32xf32, #tpu.memory_space<vmem>>, vector<40x32xf32>
      %40 = arith.truncf %39 : vector<40x32xf32> to vector<40x32xbf16>
      %41 = arith.truncf %38 : vector<32x128xf32> to vector<32x128xbf16>
      %cst_20 = arith.constant dense<0.000000e+00> : vector<40x128xf32>
      %42 = tpu.matmul %40, %41, %cst_20 {dimension_numbers = #tpu.dot_dimension_numbers<[1], [0], [0], [1], [0, 0, 1, 1], [], []>} : vector<40x32xbf16>, vector<32x128xbf16>, vector<40x128xf32> -> vector<40x128xf32>
      %c0_21 = arith.constant 0 : index
      %c0_22 = arith.constant 0 : index
      %43 = vector.load %arg4[%c0_21, %c0_22] : memref<40x1xf32, #tpu.memory_space<vmem>>, vector<40x1xf32>
      %44 = vector.broadcast %43 : vector<40x1xf32> to vector<40x128xf32>
      %45 = arith.addf %42, %44 : vector<40x128xf32>
      %46 = vector.extract_strided_slice %45 {offsets = [0, 0], sizes = [4, 128], strides = [1, 1]} : vector<40x128xf32> to vector<4x128xf32>
      %47 = arith.truncf %46 : vector<4x128xf32> to vector<4x128xbf16>
      %c0_23 = arith.constant 0 : index
      %c0_24 = arith.constant 0 : index
      %48 = vector.load %arg7[%c0_23, %c0_24] : memref<4x128xbf16, #tpu.memory_space<vmem>>, vector<4x128xbf16>
      tpu.vector_store %arg7[%c0_23, %c0_24], %47 {strides = array<i32>} : memref<4x128xbf16, #tpu.memory_space<vmem>>, vector<4x128xbf16>,
      %49 = vector.extract_strided_slice %45 {offsets = [4, 0], sizes = [4, 128], strides = [1, 1]} : vector<40x128xf32> to vector<4x128xf32>
      %50 = arith.truncf %49 : vector<4x128xf32> to vector<4x128xbf16>
      %c0_25 = arith.constant 0 : index
      %c0_26 = arith.constant 0 : index
      %51 = vector.load %arg8[%c0_25, %c0_26] : memref<4x128xbf16, #tpu.memory_space<vmem>>, vector<4x128xbf16>
      tpu.vector_store %arg8[%c0_25, %c0_26], %50 {strides = array<i32>} : memref<4x128xbf16, #tpu.memory_space<vmem>>, vector<4x128xbf16>,
      %52 = vector.extract_strided_slice %45 {offsets = [8, 0], sizes = [32, 128], strides = [1, 1]} : vector<40x128xf32> to vector<32x128xf32>
      %53 = arith.truncf %52 : vector<32x128xf32> to vector<32x128xbf16>
      %c0_27 = arith.constant 0 : index
      %c0_28 = arith.constant 0 : index
      %54 = vector.load %arg9[%c0_27, %c0_28] : memref<32x128xbf16, #tpu.memory_space<vmem>>, vector<32x128xbf16>
      tpu.vector_store %arg9[%c0_27, %c0_28], %53 {strides = array<i32>} : memref<32x128xbf16, #tpu.memory_space<vmem>>, vector<32x128xbf16>,
    } else {
    }
    %c128_i32 = arith.constant 128 : i32
    %3 = arith.muli %arg1, %c128_i32 : i32
    %4 = tpu.assume_multiple %3, 128 : i32
    %c0 = arith.constant 0 : index
    %5 = arith.index_cast %4 : i32 to index
    %6 = vector.load %arg8[%c0, %5] : memref<4x128xbf16, #tpu.memory_space<vmem>>, vector<4x128xbf16>
    %c0_1 = arith.constant 0 : index
    %c0_2 = arith.constant 0 : index
    %7 = vector.load %arg7[%c0_1, %c0_2] : memref<4x128xbf16, #tpu.memory_space<vmem>>, vector<4x128xbf16>
    %cst = arith.constant dense<0.000000e+00> : vector<128x128xf32>
    %8 = tpu.matmul %7, %6, %cst {dimension_numbers = #tpu.dot_dimension_numbers<[0], [0], [1], [1], [0, 1, 1, 1], [], []>} : vector<4x128xbf16>, vector<4x128xbf16>, vector<128x128xf32> -> vector<128x128xf32>
    %9 = tpu.iota {dimensions = array<i32: 0>} : vector<128x128xi32>
    %c64_i32 = arith.constant 64 : i32
    %10 = vector.broadcast %c64_i32 : i32 to vector<128x128xi32>
    %11 = arith.cmpi slt, %9, %10 : vector<128x128xi32>
    %cst_3 = arith.constant -1.000000e+30 : f32
    %12 = vector.broadcast %cst_3 : f32 to vector<128x128xf32>
    %13 = arith.select %11, %8, %12 : vector<128x128xi1>, vector<128x128xf32>
    %cst_4 = arith.constant dense<0xFF800000> : vector<128xf32>
    %14 = vector.multi_reduction <maximumf>, %13, %cst_4 [0] : vector<128x128xf32> to vector<128xf32>
    %15 = vector.shape_cast %14 : vector<128xf32> to vector<1x128xf32>
    %16 = vector.broadcast %15 : vector<1x128xf32> to vector<128x128xf32>
    %17 = arith.subf %13, %16 : vector<128x128xf32>
    %18 = math.exp %17 : vector<128x128xf32>
    %cst_5 = arith.constant dense<0.000000e+00> : vector<128xf32>
    %19 = vector.multi_reduction <add>, %18, %cst_5 [0] : vector<128x128xf32> to vector<128xf32>
    %20 = vector.shape_cast %19 : vector<128xf32> to vector<1x128xf32>
    %21 = tpu.reciprocal %20 {approx = true} : vector<1x128xf32> -> vector<1x128xf32>
    %22 = vector.broadcast %21 : vector<1x128xf32> to vector<128x128xf32>
    %23 = arith.mulf %18, %22 : vector<128x128xf32>
    %c0_6 = arith.constant 0 : index
    %c0_7 = arith.constant 0 : index
    %24 = vector.load %arg9[%c0_6, %c0_7] : memref<32x128xbf16, #tpu.memory_space<vmem>>, vector<32x128xbf16>
    %25 = arith.truncf %23 : vector<128x128xf32> to vector<128x128xbf16>
    %cst_8 = arith.constant dense<0.000000e+00> : vector<32x128xf32>
    %26 = tpu.matmul %24, %25, %cst_8 {dimension_numbers = #tpu.dot_dimension_numbers<[1], [0], [0], [1], [0, 0, 1, 1], [], []>} : vector<32x128xbf16>, vector<128x128xbf16>, vector<32x128xf32> -> vector<32x128xf32>
    %c0_9 = arith.constant 0 : index
    %c0_10 = arith.constant 0 : index
    %27 = arith.index_cast %4 : i32 to index
    %28 = vector.load %arg2[%c0_9, %c0_10, %27] : memref<1x32x128xf32, #tpu.memory_space<vmem>>, vector<1x32x128xf32>
    %29 = vector.shape_cast %28 : vector<1x32x128xf32> to vector<32x128xf32>
    %c0_11 = arith.constant 0 : index
    %30 = memref.load %arg5[%c0_11] : memref<1xf32, #tpu.memory_space<smem>>
    %31 = vector.broadcast %30 : f32 to vector<32x128xf32>
    %32 = arith.mulf %31, %26 : vector<32x128xf32>
    %33 = arith.addf %32, %29 : vector<32x128xf32>
    %c0_12 = arith.constant 0 : index
    %c0_13 = arith.constant 0 : index
    %c0_14 = arith.constant 0 : index
    %34 = vector.load %arg6[%c0_12, %c0_13, %c0_14] : memref<1x32x128xf32, #tpu.memory_space<vmem>>, vector<1x32x128xf32>
    %35 = vector.shape_cast %34 : vector<1x32x128xf32> to vector<32x128xf32>
    %36 = vector.shape_cast %33 : vector<32x128xf32> to vector<1x32x128xf32>
    tpu.vector_store %arg6[%c0_12, %c0_13, %c0_14], %36 {strides = array<i32>} : memref<1x32x128xf32, #tpu.memory_space<vmem>>, vector<1x32x128xf32>,
    return
  }
  func.func @transform_0(%arg0: i32, %arg1: i32) -> (i32, i32, i32) {
    %c0_i32 = arith.constant 0 : i32
    %c0_i32_0 = arith.constant 0 : i32
    %c0_i32_1 = arith.constant 0 : i32
    return %arg0, %c0_i32, %c0_i32_0 : i32, i32, i32
  }
  func.func @transform_1(%arg0: i32, %arg1: i32) -> (i32, i32) {
    %c0_i32 = arith.constant 0 : i32
    %c0_i32_0 = arith.constant 0 : i32
    %c0_i32_1 = arith.constant 0 : i32
    return %c0_i32, %c0_i32_0 : i32, i32
  }
  func.func @transform_2(%arg0: i32, %arg1: i32) -> (i32, i32) {
    %c0_i32 = arith.constant 0 : i32
    %c0_i32_0 = arith.constant 0 : i32
    %c0_i32_1 = arith.constant 0 : i32
    return %c0_i32, %c0_i32_0 : i32, i32
  }
  func.func @transform_3(%arg0: i32, %arg1: i32) -> i32 {
    %c0_i32 = arith.constant 0 : i32
    %c0_i32_0 = arith.constant 0 : i32
    return %c0_i32 : i32
  }
  func.func @transform_4(%arg0: i32, %arg1: i32) -> (i32, i32, i32) {
    %c0_i32 = arith.constant 0 : i32
    %c0_i32_0 = arith.constant 0 : i32
    return %arg0, %c0_i32, %arg1 : i32, i32, i32
  }
}

</mosaic_0001>

<bundles_post_ra>
// kernel: tpu_custom_call.1
= control target key start
LH: loop header
LB: loop body
LE: loop exit
PB: predicated region body
PF: predicated region fallthrough
CT: control target
= control target key end

     0   :  { %s1344_s0 = inlined_call_operand.vmem [shape: f32[2,32,128], index: 0, kind: input, shape index: {}]   ;;  %s1345_s1 = inlined_call_operand.vmem [shape: f32[40,32], index: 1, kind: input, shape index: {}]   ;;  %s1346_s2 = inlined_call_operand.vmem [shape: f32[40,1], index: 2, kind: input, shape index: {}]   ;;  %s1347_s3 = inlined_call_operand.<no memory space> [shape: f32[1], index: 3, kind: input, shape index: {}]   ;;  %s1348_s4 = inlined_call_operand.hbm [shape: f32[2,32,128], index: 4, kind: output, shape index: {}]  }
   0x1   :  { %9 = sst [smem:[#allocation5]] %s1347_s3 }
   0x2   :  { %10 = vsyncpa [#allocation7], 0 }
   0x3   :  { %12 = vsyncpa [#allocation7 + $0x1], 0  ;;  %s1170_s17 = smov 0   ;;  %s1172_s18 = smov 0  }
   0x4   :  { %s1174_s19 = smov 0   ;;  %s1176_s20 = smov 0  }
   0x5   :  { %s1178_s21 = smov 0   ;;  %s1180_s22 = smov 0  }
   0x6 LB: > { %s846_s3 = sadd.s32 4294967295, %s1133_s22   ;;  %s847_s23 = sadd.s32 4294967294, %s1133_s22   ;;  %s1133_s22 = sphi %s1180_s22, %s18_s22   ;;  %s1129_s21 = sphi %s1178_s21, %s1355_s21   ;;  %s1125_s20 = sphi %s1176_s20, %s1354_s20   ;;  %s1121_s19 = sphi %s1174_s19, %s1353_s19   ;;  %s1117_s18 = sphi %s1172_s18, %s1352_s18   ;;  %s1113_s17 = sphi %s1170_s17, %s1351_s17  }
   0x7   : > { %s30_s24 = sadd.s32 1, %s1129_s21  ;;  %s128_s25 = sadd.s32 1, %s1121_s19 }
   0x8   : > { %p32_p0 = scmp.ge.s32.totalorder %s30_s24, 2  ;;  %p138_p1 = scmp.ne.s32.totalorder %s1121_s19, %s1117_s18 }
   0x9   : > { %p139_p2 = scmp.eq.s32.totalorder %s846_s3, 1  ;;  %p144_p3 = scmp.ne.s32.totalorder %s1117_s18, %s1113_s17 }
   0xa   : > { %s1357_s24 = smov (%p32_p0, %s30_s24), 0  ;;  %p145_p5 = scmp.eq.s32.totalorder %s847_s23, 1 }
   0xb   : > { %p1210_p4 = por %p139_p2, %p138_p1  ;;  %s123_s27 = ssub.s32 %s1129_s21, %s1357_s24 }
   0xc   : > { %p850_p6 = scmp.ge.s32.totalorder %s1133_s22, 1  ;;  %p126_p7 = scmp.eq.s32.totalorder %s123_s27, 0 }
   0xd   : > { %p1217_p8 = por %p145_p5, %p144_p3  ;;  %p180_p9 = scmp.lt.s32.totalorder %s1133_s22, 3 }
   0xe   : > { %s1223_s29 = scalar_select %p126_p7, %s1121_s19, %s128_s25  }
   0xf   : > { %p181_p10 = pnand %p850_p6, %p180_p9 }
  0x10   : > { %p206_p11 = scmp.lt.s32.totalorder (!%p181_p10), %s1125_s20, 1  ;;  %s742_s12 = sld [smem:[#allocation5]] (!%p181_p10) }
  0x11   : > { %184 = sbr.rel (%p181_p10) target bundleno = 901 (0x385), region = 36  ;;  %s203_s13 = sand.u32 (!%p181_p10), 1, %s1117_s18  }
  0x12   : > { %s881_s3 = sshll.u32 (!%p181_p10), %s1125_s20, 9  ;;  %s1299_s30 = scalar_lea.sflag (!%p181_p10), [#allocation7], %s203_s13 }
  0x13   : > { %s1297_s27 = scalar_lea.hbm (!%p181_p10), %s1348_s4, %s881_s3  ;;  %s1139_s5 = smov (!%p181_p10), [#allocation6]  }
  0x16   : > { %v1135_v0 = vmov 0.0   ;;  %vm1136_vm0 = vmmov 0   ;;  %v230_v1 = vld [vmem:[%s1346_s2] sm:$0xff]  ;;  %s207_s6 = scalar_select %p206_p11, %s1125_s20, 1  ;;  %v1137_v2 = vmov 0   ;;  %v231_v3 = vld [vmem:[%s1346_s2 + $0x8] sm:$0xff]  ;;  %v332_v19 = vlaneseq }
  0x17   : > { %917 = vmatprep.subr.bf16.mxu0 %v1135_v0  ;;  %921 = vmatprep.mubr.msk.bf16.mxu0 %vm1136_vm0, %v1135_v0  ;;  %v232_v4 = vld [vmem:[%s1346_s2 + $0x10] sm:$0xff]  ;;  %v220_v11 = vld [vmem:[%s1345_s1] sm:$0xff]  ;;  %v221_v12 = vld [vmem:[%s1345_s1 + $0x8] sm:$0xff]  ;;  %vm260_vm1 = vcmask 261120   ;;  %v1138_v17 = vmov 1983009808  }
  0x18   : > { %1033 = vset.pattern.permute.xlu0 %v1137_v2  ;;  %1034 = vset.pattern.permute.xlu1 %v1137_v2  ;;  %s876_s9 = sshll.u32 %s207_s6, 5  ;;  %v225_v13 = vpack.c.bf16 %v221_v12, %v220_v11  ;;  %v222_v14 = vld [vmem:[%s1345_s1 + $0x10] sm:$0xff]  ;;  %v223_v15 = vld [vmem:[%s1345_s1 + $0x18] sm:$0xff]  ;;  %v330_v18 = vunpack.c.l.s4 %v1138_v17  ;;  %v333_v21 = vshrl.u32 %v332_v19, 7  ;;  %v224_v40 = vld [vmem:[%s1345_s1 + $0x20] sm:$0xff]  ;;  %vm407_vm2 = vcmask 1041408  }
  0x19   : > { %237 = vperm.xlu0 %1033, %v230_v1   ;;  %242 = vperm.xlu1 %1034, %v231_v3   ;;  %s210_s14 = scalar_lea.vmem %s1344_s0, %s876_s9  ;;  %v226_v16 = vpack.c.bf16 %v223_v15, %v222_v14  ;;  %v233_v41 = vld [vmem:[%s1346_s2 + $0x18] sm:$0xff]  ;;  %v227_v42 = vpack.c.bf16 %v224_v40, %v224_v40  ;;  %v234_v43 = vld [vmem:[%s1346_s2 + $0x20] sm:$0xff]  ;;  %vm382_vm3 = vcmask 31744   ;;  %s1061_s6 = sshll.u32 %s1139_s5, 4  ;;  %s1062_s6 = int_to_ptr.vmem [resolvable:$false] %s1061_s6 }
  0x1a   : > { %v1240_v5 = vld [vmem:[%s210_s14 + $0x10] sm:$0xff]  ;;  %v1242_v6 = vld [vmem:[%s210_s14 + $0x18] sm:$0xff]  ;;  %v1244_v7 = vld [vmem:[%s210_s14] sm:$0xff]  ;;  %v331_v20 = vunpack.c.0.s8 %v330_v18  ;;  %s1063_s7 = scalar_lea.vmem %s1062_s6, 1024 }
  0x1b   : > { %v229_v8 = vpack.c.bf16 %v1242_v6, %v1240_v5  ;;  %v1248_v9 = vld [vmem:[%s210_s14 + $0x8] sm:$0xff]  ;;  %s851_s14 = sshll.u32 %s203_s13, 5 }
  0x1c   : > { %v228_v10 = vpack.c.bf16 %v1248_v9, %v1244_v7  ;;  %v334_v26 = vsub.s32 %v331_v20, %v333_v21  ;;  %s205_s15 = scalar_lea.vmem [#allocation6], %s851_s14 }
  0x1d   : > { %247 = vperm.xlu1 %1034, %v232_v4   ;;  %918 = vmatpush3.bf16.msra.mxu0 %v229_v8  ;;  %s771_s16 = sshll.u32 %s205_s15, 4  ;;  %s1291_s16 = int_to_ptr.vmem [resolvable:$true] %s771_s16 }
  0x1e   : > { %919 = vmatprep.subr.bf16.mxu0 %v1135_v0  ;;  %s1057_s20 = scalar_lea.vmem %s1291_s16, 512  ;;  %p1064_p1 = scmp.lt.s32.totalorder %s1291_s16, %s1062_s6 }
  0x1f   : > { %p1058_p12 = scmp.ne.s32.totalorder %s1291_s16, %s1057_s20  ;;  %p1065_p2 = scmp.lt.s32.totalorder %s1063_s7, %s1057_s20 }
  0x21   : > { %920 = vmatpush3.bf16.msra.mxu0 %v228_v10  ;;  %252 = vperm.xlu1 %1034, %v233_v41   ;;  %p1059_p13 = pnand %p1058_p12, %p1210_p4  ;;  %p1066_p3 = por %p1065_p2, %p1064_p1 }
  0x23   : > { %p1060_p0 = pneg %p1059_p13 }
  0x24   : > { %922 = vmatmul.mubr.msk.bf16.vlgmr.msra.gmra.mxu0 %vm260_vm1, %v225_v13 }
  0x25   : > { %925 = vmatprep.mubr.msk.bf16.mxu0 %vm1136_vm0, %v1135_v0  ;;  %257 = vperm.xlu1 %1034, %v234_v43   ;;  %p1067_p5 = pnand %p1066_p3, %p1060_p0 }
  0x2c   : > { %926 = vmatmul.mubr.msk.bf16.gmra.mxu0 %vm260_vm1, %v226_v16 }
  0x2d   : > { %929 = vmatprep.mubr.msk.bf16.mxu0 %vm1136_vm0, %v1135_v0 }
  0x34   : > { %930 = vmatmul.mubr.msk.bf16.gmra.mxu0 %vm260_vm1, %v227_v42 }
  0x94   : > { %v238_v22 = vpop.permute.xlu0 %237  ;;  %v243_v24 = vpop.permute.xlu1 %242 }
  0x98   : > { %v248_v32 = vpop.permute.xlu1 %247 }
  0x9c   : > { %v253_v55 = vpop.permute.xlu1 %252 }
  0xa0   : > { %v258_v59 = vpop.permute.xlu1 %257 }
  0xe4   : > { %v304_v23 = vpop.f32.mrf.mxu0 }
  0xe5   : > { %v305_v25 = vadd.f32 %v304_v23, %v238_v22 }
  0xe6   : > { %v923_v27 = vpop.f32.mrf.mxu0 }
  0xe7   : > { %v326_v28 = vpack.c.bf16 %v305_v25, %v305_v25 }
  0xe8   : > { %v307_v29 = vpop.f32.mrf.mxu0 }
  0xe9   : > { %327 = vst [vmem:[#allocation2] sm:$0x3] %v326_v28  ;;  %v335_v30 = vrot.slane %v326_v28, %v334_v26  ;;  %v308_v35 = vadd.f32 %v307_v29, %v243_v24 }
  0xea   : > { %v924_v31 = vpop.f32.mrf.mxu0 }
  0xeb   : > { %v336_v33 = vcombine.high %v335_v30, %v335_v30 }
  0xec   : > { %v312_v34 = vpop.f32.mrf.mxu0 }
  0xed   : > { %338 = vst [vmem:[#allocation3] sm:$0x3] %v336_v33  ;;  %v313_v36 = vadd.f32 %v312_v34, %v248_v32 }
  0xee   : > { %v927_v37 = vpop.f32.mrf.mxu0 }
  0xef   : > { %v885_v38 = vpack.c.bf16 %v313_v36, %v308_v35 }
  0xf0   : > { %v365_v39 = vld [vmem:[#allocation2] sm:$0x3]  ;;  %v315_v56 = vpop.f32.mrf.mxu0 }
  0xf1   : > { %886 = vst [vmem:[#allocation4] sm:$0xff] %v885_v38   ;;  %366 = vxpose.xlu0.c.b16.start.end [1/1] (short) %v365_v39, 128  ;;  %v316_v58 = vadd.f32 %v315_v56, %v253_v55 }
  0xf2   : > { %v928_v57 = vpop.f32.mrf.mxu0 }
  0xf4   : > { %v364_v44 = vld [vmem:[#allocation3] sm:$0x3]  ;;  %v320_v60 = vpop.f32.mrf.mxu0 }
  0xf5   : > { %971 = vmatprep.subr.msk.bf16.mxu1 %vm407_vm2, %v364_v44  ;;  %v409_v45 = vsel %vm407_vm2, %v364_v44, 0  ;;  %v321_v61 = vadd.f32 %v320_v60, %v258_v59 }
  0xf6   : > { %934 = vmatpush3.bf16.msra.mxu1 %v409_v45  ;;  %v931_v62 = vpop.f32.mrf.mxu0 }
  0xf7   : > { %v890_v63 = vpack.c.bf16 %v321_v61, %v316_v58 }
  0xf8   : > { %v1035_v54 = vld [vmem:[#allocation4] sm:$0xff]   ;;  %v323_v0 = vpop.f32.mrf.mxu0 }
  0xf9   : > { %892 = vst [vmem:[#allocation4 + $0x8] sm:$0xff] %v890_v63  }
  0xfa   : > { %v932_v1 = vpop.f32.mrf.mxu0 }
 0x153   : > { %v374_v46 = vpop.trf.xlu0 }
 0x154   : > { %935 = vmatprep.mubr.msk.bf16.mxu1 %vm382_vm3, %v374_v46 }
 0x157   : > { %v375_v47 = vpop.trf.xlu0 }
 0x158   : > { %936 = vmatmul.mubr.msk.bf16.vlgmr.msra.gmra.mxu1 %vm382_vm3, %v375_v47 }
 0x15b   : > { %v376_v48 = vpop.trf.xlu0 }
 0x15c   : > { %939 = vmatprep.mubr.msk.bf16.mxu1 %vm382_vm3, %v376_v48 }
 0x15f   : > { %v377_v49 = vpop.trf.xlu0 }
 0x160   : > { %940 = vmatmul.mubr.msk.bf16.gmra.mxu1 %vm382_vm3, %v377_v49 }
 0x163   : > { %v378_v50 = vpop.trf.xlu0 }
 0x164   : > { %943 = vmatprep.mubr.msk.bf16.mxu1 %vm382_vm3, %v378_v50 }
 0x167   : > { %v379_v51 = vpop.trf.xlu0 }
 0x168   : > { %944 = vmatmul.mubr.msk.bf16.gmra.mxu1 %vm382_vm3, %v379_v51 }
 0x16b   : > { %v380_v52 = vpop.trf.xlu0 }
 0x16c   : > { %947 = vmatprep.mubr.msk.bf16.mxu1 %vm382_vm3, %v380_v52 }
 0x16f   : > { %v381_v53 = vpop.trf.xlu0 }
 0x170   : > { %948 = vmatmul.mubr.msk.bf16.gmra.mxu1 %vm382_vm3, %v381_v53 }
 0x171   : > { %967 = vmatprep.mubr.bf16.mxu1 %v1035_v54 }
 0x218   : > { %v937_v2 = vpop.f32.mrf.mxu1 }
 0x21a   : > { %v445_v3 = vpop.f32.mrf.mxu1 }
 0x21c   : > { %v938_v4 = vpop.f32.mrf.mxu1 }
 0x21e   : > { %v448_v8 = vpop.f32.mrf.mxu1 }
 0x220   : > { %v941_v10 = vpop.f32.mrf.mxu1 }
 0x221   : > { %v559_v12 = vmax.f32 %v937_v2, %v941_v10 }
 0x222   : > { %v461_v11 = vpop.f32.mrf.mxu1 }
 0x223   : > { %v557_v13 = vmax.f32 %v445_v3, %v461_v11  ;;  %v563_v17 = vmax.f32 %v559_v12, -1e+30 }
 0x224   : > { %v942_v14 = vpop.f32.mrf.mxu1 }
 0x225   : > { %v560_v15 = vmax.f32 %v938_v4, %v942_v14  ;;  %v561_v18 = vmax.f32 %v557_v13, -1e+30  ;;  %v567_v25 = vmax.f32 %v563_v17, -1e+30 }
 0x226   : > { %v464_v16 = vpop.f32.mrf.mxu1 }
 0x227   : > { %v564_v19 = vmax.f32 %v560_v15, -1e+30  ;;  %v558_v20 = vmax.f32 %v448_v8, %v464_v16  ;;  %v565_v26 = vmax.f32 %v561_v18, -1e+30 }
 0x228   : > { %v945_v21 = vpop.f32.mrf.mxu1 }
 0x229   : > { %v568_v22 = vmax.f32 %v564_v19, -1e+30  ;;  %v562_v23 = vmax.f32 %v558_v20, -1e+30 }
 0x22a   : > { %v477_v24 = vpop.f32.mrf.mxu1 }
 0x22b   : > { %v566_v27 = vmax.f32 %v562_v23, -1e+30  ;;  %v570_v29 = vmax.f32 %v567_v25, %v568_v22 }
 0x22c   : > { %v946_v28 = vpop.f32.mrf.mxu1 }
 0x22d   : > { %v569_v30 = vmax.f32 %v565_v26, %v566_v27 }
 0x22e   : > { %v480_v31 = vpop.f32.mrf.mxu1 }
 0x22f   : > { %v571_v32 = vmax.f32 %v569_v30, %v570_v29 }
 0x230   : > { %v949_v33 = vpop.f32.mrf.mxu1 }
 0x231   : > { %v572_v34 = vrot.slane %v571_v32, 4 }
 0x232   : > { %v493_v35 = vpop.f32.mrf.mxu1 }
 0x233   : > { %v573_v36 = vmax.f32 %v571_v32, %v572_v34 }
 0x234   : > { %v950_v37 = vpop.f32.mrf.mxu1 }
 0x235   : > { %v574_v38 = vrot.slane %v573_v36, 2 }
 0x236   : > { %v496_v39 = vpop.f32.mrf.mxu1 }
 0x237   : > { %v575_v40 = vmax.f32 %v573_v36, %v574_v38 }
 0x239   : > { %v576_v41 = vrot.slane %v575_v40, 1 }
 0x23b   : > { %v577_v42 = vmax.f32 %v575_v40, %v576_v41 }
 0x23d   : > { %v578_v43 = vsub.f32 %v445_v3, %v577_v42  ;;  %v579_v44 = vsub.f32 %v448_v8, %v577_v42  ;;  %v580_v45 = vsub.f32 %v937_v2, %v577_v42  ;;  %v581_v46 = vsub.f32 %v938_v4, %v577_v42 }
 0x23e   : > { %v582_v49 = vsub.f32 %v461_v11, %v577_v42  ;;  %v583_v51 = vsub.f32 %v464_v16, %v577_v42  ;;  %v584_v53 = vsub.f32 %v941_v10, %v577_v42  ;;  %v585_v55 = vsub.f32 %v942_v14, %v577_v42 }
 0x23f   : > { %v594_v47 = vmul.f32 1.442695, %v578_v43  ;;  %v596_v48 = vmul.f32 1.442695, %v579_v44  ;;  %v598_v50 = vmul.f32 1.442695, %v580_v45 }
 0x240   : > { %v600_v52 = vmul.f32 1.442695, %v581_v46  ;;  %v602_v54 = vmul.f32 1.442695, %v582_v49  ;;  %v604_v56 = vmul.f32 1.442695, %v583_v51 }
 0x241   : > { %1037 = vpow2.f32 %v594_v47  ;;  %v586_v57 = vsub.f32 -1e+30, %v577_v42  ;;  %v606_v58 = vmul.f32 1.442695, %v584_v53  ;;  %v608_v59 = vmul.f32 1.442695, %v585_v55 }
 0x242   : > { %1039 = vpow2.f32 %v596_v48  ;;  %v1036_v46 = vld [vmem:[#allocation4 + $0x8] sm:$0xff]   ;;  %v743_v47 = vstv %s742_s12 }
 0x243   : > { %1041 = vpow2.f32 %v598_v50  ;;  %v610_v60 = vmul.f32 1.442695, %v586_v57 }
 0x244   : > { %1043 = vpow2.f32 %v600_v52 }
 0x245   : > { %1045 = vpow2.f32 %v602_v54 }
 0x246   : > { %1047 = vpow2.f32 %v604_v56 }
 0x247   : > { %1049 = vpow2.f32 %v606_v58 }
 0x248   : > { %1051 = vpow2.f32 %v608_v59 }
 0x249   : > { %1053 = vpow2.f32 %v610_v60 }
 0x24e   : > { %v1038_v61 = vpop.eup %1037 }
 0x24f   : > { %v1040_v62 = vpop.eup %1039 }
 0x250   : > { %v626_v63 = vadd.f32 %v1040_v62, %v1038_v61  ;;  %v1042_v0 = vpop.eup %1041 }
 0x251   : > { %v1044_v2 = vpop.eup %1043 }
 0x252   : > { %v627_v1 = vadd.f32 %v1042_v0, %v626_v63  ;;  %v1046_v4 = vpop.eup %1045 }
 0x253   : > { %v1048_v10 = vpop.eup %1047 }
 0x254   : > { %v628_v3 = vadd.f32 %v1044_v2, %v627_v1  ;;  %v1050_v12 = vpop.eup %1049 }
 0x255   : > { %v1052_v14 = vpop.eup %1051 }
 0x256   : > { %v629_v8 = vadd.f32 %v1046_v4, %v628_v3  ;;  %v1054_v16 = vpop.eup %1053 }
 0x258   : > { %v630_v11 = vadd.f32 %v1048_v10, %v629_v8 }
 0x25a   : > { %v631_v13 = vadd.f32 %v1050_v12, %v630_v11 }
 0x25c   : > { %v632_v15 = vadd.f32 %v1052_v14, %v631_v13 }
 0x25e   : > { %v633_v17 = vadd.f32 %v1054_v16, %v632_v15 }
 0x260   : > { %v634_v18 = vadd.f32 %v1054_v16, %v633_v17 }
 0x262   : > { %v635_v19 = vadd.f32 %v1054_v16, %v634_v18 }
 0x264   : > { %v636_v20 = vadd.f32 %v1054_v16, %v635_v19 }
 0x266   : > { %v637_v21 = vadd.f32 %v1054_v16, %v636_v20 }
 0x268   : > { %v638_v22 = vadd.f32 %v1054_v16, %v637_v21 }
 0x26a   : > { %v639_v23 = vadd.f32 %v1054_v16, %v638_v22 }
 0x26c   : > { %v640_v24 = vadd.f32 %v1054_v16, %v639_v23 }
 0x26e   : > { %v641_v25 = vrot.slane %v640_v24, 4 }
 0x270   : > { %v642_v26 = vadd.f32 %v641_v25, %v640_v24 }
 0x272   : > { %v643_v27 = vrot.slane %v642_v26, 2 }
 0x274   : > { %v644_v28 = vadd.f32 %v643_v27, %v642_v26 }
 0x276   : > { %v645_v29 = vrot.slane %v644_v28, 1 }
 0x278   : > { %v646_v30 = vadd.f32 %v645_v29, %v644_v28 }
 0x27a   : > { %1055 = vrcp.f32 %v646_v30 }
 0x287   : > { %v1056_v31 = vpop.eup %1055 }
 0x288   : > { %v656_v32 = vmul.f32 %v1056_v31, %v1054_v16  ;;  %v654_v33 = vmul.f32 %v1056_v31, %v1050_v12  ;;  %v655_v34 = vmul.f32 %v1056_v31, %v1052_v14  ;;  %v652_v35 = vmul.f32 %v1056_v31, %v1046_v4 }
 0x289   : > { %v653_v36 = vmul.f32 %v1056_v31, %v1048_v10  ;;  %v650_v37 = vmul.f32 %v1056_v31, %v1042_v0  ;;  %v651_v38 = vmul.f32 %v1056_v31, %v1044_v2  ;;  %v648_v39 = vmul.f32 %v1056_v31, %v1038_v61 }
 0x28a   : > { %v672_v40 = vpack.c.bf16 %v656_v32, %v656_v32  ;;  %v671_v41 = vpack.c.bf16 %v655_v34, %v654_v33  ;;  %v649_v42 = vmul.f32 %v1056_v31, %v1040_v62 }
 0x28b   : > { %v670_v43 = vpack.c.bf16 %v653_v36, %v652_v35  ;;  %v669_v44 = vpack.c.bf16 %v651_v38, %v650_v37 }
 0x28c   : > { %951 = vmatprep.subr.bf16.mxu1 %v672_v40  ;;  %v668_v45 = vpack.c.bf16 %v649_v42, %v648_v39 }
 0x28d   : > { %952 = vmatpush3.bf16.msra.mxu1 %v672_v40 }
 0x28e   : > { %953 = vmatprep.subr.bf16.mxu1 %v672_v40 }
 0x291   : > { %954 = vmatpush3.bf16.msra.mxu1 %v672_v40 }
 0x292   : > { %955 = vmatprep.subr.bf16.mxu1 %v672_v40 }
 0x295   : > { %956 = vmatpush3.bf16.msra.mxu1 %v672_v40 }
 0x296   : > { %957 = vmatprep.subr.bf16.mxu1 %v672_v40 }
 0x299   : > { %958 = vmatpush3.bf16.msra.mxu1 %v672_v40 }
 0x29a   : > { %959 = vmatprep.subr.bf16.mxu1 %v671_v41 }
 0x29d   : > { %960 = vmatpush3.bf16.msra.mxu1 %v671_v41 }
 0x29e   : > { %961 = vmatprep.subr.bf16.mxu1 %v670_v43 }
 0x2a1   : > { %962 = vmatpush3.bf16.msra.mxu1 %v670_v43 }
 0x2a2   : > { %963 = vmatprep.subr.bf16.mxu1 %v669_v44 }
 0x2a5   : > { %964 = vmatpush3.bf16.msra.mxu1 %v669_v44 }
 0x2a6   : > { %965 = vmatprep.subr.bf16.mxu1 %v668_v45 }
 0x2a9   : > { %966 = vmatpush3.bf16.msra.mxu1 %v668_v45 }
 0x2ac   : > { %968 = vmatmul.mubr.bf16.vlgmr.msra.gmra.mxu1 %v1036_v46 }
 0x36c   : > { %v969_v48 = vpop.f32.mrf.mxu1 }
 0x36d   : > { %v746_v49 = vmul.f32 %v969_v48, %v743_v47 }
 0x36e   : > { %v722_v50 = vpop.f32.mrf.mxu1 }
 0x36f   : > { %v750_v51 = vadd.f32 %v746_v49, %v1240_v5  ;;  %v744_v52 = vmul.f32 %v743_v47, %v722_v50 }
 0x370   : > { %v970_v53 = vpop.f32.mrf.mxu1 }
 0x371   : > { %754 = vst [vmem:[%s205_s15 + $0x10] sm:$0xff] %v750_v51  ;;  %v748_v54 = vadd.f32 %v744_v52, %v1244_v7  ;;  %v747_v55 = vmul.f32 %v970_v53, %v743_v47 }
 0x372   : > { %v725_v56 = vpop.f32.mrf.mxu1 }
 0x373   : > { %752 = vst [vmem:[%s205_s15] sm:$0xff] %v748_v54  ;;  %v751_v57 = vadd.f32 %v747_v55, %v1242_v6  ;;  %v745_v58 = vmul.f32 %v743_v47, %v725_v56 }
 0x375   : > { %755 = vst [vmem:[%s205_s15 + $0x18] sm:$0xff] %v751_v57  ;;  %v749_v5 = vadd.f32 %v745_v58, %v1248_v9 }
 0x377   : > { %753 = vst [vmem:[%s205_s15 + $0x8] sm:$0xff] %v749_v5 }
 0x378   : > { %1070 = shalt.err (!%p1067_p5)
}
 0x379   : > { %s1071_s8 = scalar_lea.hbm %s1297_s27, 512  ;;  %s1075_s11 = scalar_lea.hbm %s1348_s4, 1024 }
 0x37a   : > { %p1072_p6 = scmp.ne.s32.totalorder %s1297_s27, %s1071_s8  ;;  %p1076_p10 = scmp.lt.s32.totalorder %s1297_s27, %s1348_s4 }
 0x37b   : > { %p1077_p11 = scmp.lt.s32.totalorder %s1075_s11, %s1071_s8 }
 0x37c   : > { %p1073_p7 = pnand %p1072_p6, %p1210_p4 }
 0x37d   : > { %p1078_p12 = por %p1077_p11, %p1076_p10 }
 0x37e   : > { %p1074_p9 = pneg %p1073_p7 }
 0x380   : > { %p1079_p13 = pnand %p1078_p12, %p1074_p9 }
 0x382   : > { %1082 = shalt.err (!%p1079_p13)
}
 0x383   : > { %s1140_s14 = smov 128   ;;  %s1141_s15 = smov 8  }
 0x384   : > { %972 = dma.vmem_to_hbm [thread:$0]  (%p1210_p4), %s1291_s16, 512, %s1297_s27, %s1299_s30, %s1140_s14, %s1140_s14, %s1141_s15  }
 0x385 PF: > { %p978_p0 = scmp.ge.s32.totalorder %s1133_s22, 2  ;;  %s786_s3 = sand.u32 1, %s1113_s17  }
 0x386   : > { %s787_s23 = scalar_lea.sflag [#allocation7], %s786_s3 }
 0x387   : > { %p975_p1 = pnand %p978_p0, %p1217_p8 }
 0x389   : > { %p976_p2 = pneg %p975_p1 }
 0x38b   : > { %1108 = dma.done.wait (%p976_p2), %s787_s23, 512  }
 0x38c   : > { %1110 = vsyncadd (%p976_p2), %s787_s23, 4294966784  ;;  %s18_s22 = sadd.s32 1, %s1133_s22   ;;  %s1351_s17 = smov %s1117_s18 }
 0x38d   : > { %p15_p3 = scmp.ge.s32.totalorder %s18_s22, 4   ;;  %s1352_s18 = smov %s1121_s19 }
 0x38e   : > { %s1353_s19 = smov %s1223_s29  ;;  %s1354_s20 = smov %s1129_s21 }
 0x38f   : > { %s1355_s21 = smov %s1357_s24  ;;  %17 = sbr.rel (!%p15_p3) target bundleno = 6 (0x6), region = 77 }
 0x394   :  { %792 = vsyncpa [#allocation7], 1 }
 0x395   :  { %794 = vsyncpa [#allocation7 + $0x1], 1 }

</bundles_post_ra>
